<compile_context>
chip_gen: v7x
topology: tpu7x:2x2x1
jax: 0.10.0
libtpu: 0.0.40
codegen_flags: <defaults>
</compile_context>

<pallas_src>
import jax
import jax.numpy as jnp
from jax import lax
from jax.experimental import pallas as pl
from jax.experimental.pallas import tpu as pltpu

# Camera intrinsics (module defaults, deterministic)
FY = 589.3664541825391 * 0.5
FX = 589.3664541825391 * 0.5
CY = 240.5 * 0.5
CX = 320.5 * 0.5

# Target ~64K f32 elements per depth block (~256 KiB in / ~768 KiB out).
_TARGET_BLOCK_ELEMS = 64 * 1024


def _choose_tile_h(H, W):
    """Row-tile height: multiple of 8 (sublane-dense), ~<=256 KiB depth block,
    and >= ~8 pipeline steps per image when the image is tall enough."""
    th = max(8, _TARGET_BLOCK_ELEMS // max(W, 1))
    # Keep at least ~8 row-tiles per image (pipeline depth / megacore balance).
    th = min(th, max(8, pl.cdiv(H, 8)))
    th = max(8, (th // 8) * 8)
    if th >= H:
        return H  # full extent is always a legal block dim, even if H % 8 != 0
    return th


def _make_kernel(tile_h, fy, fx, cy, cx):
    inv_fx = 1.0 / fx
    inv_fy = 1.0 / fy

    def kernel(depth_ref, out_ref):
        # depth_ref block: (TH, W)   (batch & channel dims squeezed)
        # out_ref   block: (3, TH, W)
        d = depth_ref[...].astype(jnp.float32)                        # (TH, W)
        row0 = (pl.program_id(1) * tile_h).astype(jnp.float32)        # scalar
        row = lax.broadcasted_iota(jnp.int32, d.shape, 0).astype(jnp.float32)
        col = lax.broadcasted_iota(jnp.int32, d.shape, 1).astype(jnp.float32)
        xg = (col - cx) * inv_fx                                      # (TH, W)
        yg = (row + (row0 - cy)) * inv_fy                             # (TH, W)
        od = out_ref.dtype
        out_ref[0] = (d * xg).astype(od)   # dense (TH, W) store
        out_ref[1] = (d * yg).astype(od)
        out_ref[2] = d.astype(od)

    return kernel


def depth_to_dense_3d_points(depth, *, fy=FY, fx=FX, cy=CY, cx=CX):
    """depth: (B, 1, H, W) float array -> (B, 3, H, W) points."""
    B, C, H, W = depth.shape
    assert C == 1, "depth must have a single channel"

    tile_h = _choose_tile_h(H, W)
    n_tiles = pl.cdiv(H, tile_h)
    kernel = _make_kernel(tile_h, fy, fx, cy, cx)

    itemsize = jnp.dtype(depth.dtype).itemsize
    cost = pl.CostEstimate(
        flops=4 * B * H * W,
        transcendentals=0,
        bytes_accessed=(1 + 3) * B * H * W * itemsize,  # 1x read + 3x write
    )

    return pl.pallas_call(
        kernel,
        out_shape=jax.ShapeDtypeStruct((B, 3, H, W), depth.dtype),
        grid_spec=pltpu.PrefetchScalarGridSpec(
            num_scalar_prefetch=0,
            grid=(B, n_tiles),
            in_specs=[pl.BlockSpec((None, None, tile_h, W),
                                   lambda b, t: (b, 0, t, 0))],
            out_specs=pl.BlockSpec((None, 3, tile_h, W),
                                   lambda b, t: (b, 0, t, 0)),
        ),
        compiler_params=pltpu.CompilerParams(
            dimension_semantics=("parallel", "parallel"),
        ),
        cost_estimate=cost,
    )(depth)


def _reference(depth, *, fy=FY, fx=FX, cy=CY, cx=CX):
    B, C, H, W = depth.shape
    col = (jnp.arange(W, dtype=jnp.float32) - cx) / fx       # (W,)
    row = (jnp.arange(H, dtype=jnp.float32) - cy) / fy       # (H,)
    xg = jnp.broadcast_to(col[None, :], (H, W))
    yg = jnp.broadcast_to(row[:, None], (H, W))
    d = depth[:, 0]                                          # (B, H, W)
    x = d * xg[None]
    y = d * yg[None]
    z = d
    return jnp.stack([x, y, z], axis=1).astype(depth.dtype)


if __name__ == "__main__":
    key = jax.random.PRNGKey(0)
    keys = jax.random.split(key, 3)

    # (B, H, W): small primary case; W not a multiple of 128; H not a multiple
    # of the row tile (exercises the padded last-tile writeback path).
    cases = [(2, 16, 16), (2, 24, 40), (1, 20, 40)]
    for k, (B, H, W) in zip(keys, cases):
        depth = jax.random.uniform(k, (B, 1, H, W), dtype=jnp.float32,
                                   minval=0.5, maxval=5.0)
        out = jax.block_until_ready(depth_to_dense_3d_points(depth))
        ref = _reference(depth)
        assert out.shape == (B, 3, H, W)
        assert jnp.allclose(out, ref, atol=1e-5, rtol=1e-5), \
            f"mismatch vs reference for shape {(B, 1, H, W)}"

    print("KERNEL_OK")
</pallas_src>

<mosaic_0001>
module attributes {stable_mosaic.version = 11 : i64} {
  func.func @kernel(%arg0: i32, %arg1: i32, %arg2: memref<1x1x8x16xf32, #tpu.memory_space<vmem>>, %arg3: memref<1x3x8x16xf32, #tpu.memory_space<vmem>>) attributes {dimension_semantics = [#tpu.dimension_semantics<parallel>, #tpu.dimension_semantics<parallel>], iteration_bounds = array<i64: 2, 2>, scalar_prefetch = 0 : i64, scratch_operands = 0 : i64, tpu.core_type = #tpu.core_type<tc>, window_params = [{transform_indices = @transform_0, window_bounds = array<i64: 1, 1, 8, 16>}, {transform_indices = @transform_1, window_bounds = array<i64: 1, 3, 8, 16>}]} {
    %c0 = arith.constant 0 : index
    %c0_0 = arith.constant 0 : index
    %c0_1 = arith.constant 0 : index
    %c0_2 = arith.constant 0 : index
    %0 = vector.load %arg2[%c0, %c0_0, %c0_1, %c0_2] : memref<1x1x8x16xf32, #tpu.memory_space<vmem>>, vector<1x1x8x16xf32>
    %1 = vector.shape_cast %0 : vector<1x1x8x16xf32> to vector<8x16xf32>
    %c8_i32 = arith.constant 8 : i32
    %2 = arith.muli %arg1, %c8_i32 : i32
    %3 = arith.sitofp %2 : i32 to f32
    %4 = tpu.iota {dimensions = array<i32: 0>} : vector<8x16xi32>
    %5 = arith.sitofp %4 : vector<8x16xi32> to vector<8x16xf32>
    %6 = tpu.iota {dimensions = array<i32: 1>} : vector<8x16xi32>
    %7 = arith.sitofp %6 : vector<8x16xi32> to vector<8x16xf32>
    %cst = arith.constant 1.602500e+02 : f32
    %8 = vector.broadcast %cst : f32 to vector<8x16xf32>
    %9 = arith.subf %7, %8 : vector<8x16xf32>
    %cst_3 = arith.constant 0.0033934745 : f32
    %10 = vector.broadcast %cst_3 : f32 to vector<8x16xf32>
    %11 = arith.mulf %9, %10 : vector<8x16xf32>
    %cst_4 = arith.constant 1.202500e+02 : f32
    %12 = arith.subf %3, %cst_4 : f32
    %13 = vector.broadcast %12 : f32 to vector<8x16xf32>
    %14 = arith.addf %5, %13 : vector<8x16xf32>
    %cst_5 = arith.constant 0.0033934745 : f32
    %15 = vector.broadcast %cst_5 : f32 to vector<8x16xf32>
    %16 = arith.mulf %14, %15 : vector<8x16xf32>
    %17 = arith.mulf %1, %11 : vector<8x16xf32>
    %c0_6 = arith.constant 0 : index
    %c0_7 = arith.constant 0 : index
    %c0_8 = arith.constant 0 : index
    %c0_9 = arith.constant 0 : index
    %18 = vector.load %arg3[%c0_6, %c0_7, %c0_8, %c0_9] : memref<1x3x8x16xf32, #tpu.memory_space<vmem>>, vector<1x1x8x16xf32>
    %19 = vector.shape_cast %18 : vector<1x1x8x16xf32> to vector<8x16xf32>
    %20 = vector.shape_cast %17 : vector<8x16xf32> to vector<1x1x8x16xf32>
    tpu.vector_store %arg3[%c0_6, %c0_7, %c0_8, %c0_9], %20 {strides = array<i32>} : memref<1x3x8x16xf32, #tpu.memory_space<vmem>>, vector<1x1x8x16xf32>,
    %21 = arith.mulf %1, %16 : vector<8x16xf32>
    %c0_10 = arith.constant 0 : index
    %c1 = arith.constant 1 : index
    %c0_11 = arith.constant 0 : index
    %c0_12 = arith.constant 0 : index
    %22 = vector.load %arg3[%c0_10, %c1, %c0_11, %c0_12] : memref<1x3x8x16xf32, #tpu.memory_space<vmem>>, vector<1x1x8x16xf32>
    %23 = vector.shape_cast %22 : vector<1x1x8x16xf32> to vector<8x16xf32>
    %24 = vector.shape_cast %21 : vector<8x16xf32> to vector<1x1x8x16xf32>
    tpu.vector_store %arg3[%c0_10, %c1, %c0_11, %c0_12], %24 {strides = array<i32>} : memref<1x3x8x16xf32, #tpu.memory_space<vmem>>, vector<1x1x8x16xf32>,
    %c0_13 = arith.constant 0 : index
    %c2 = arith.constant 2 : index
    %c0_14 = arith.constant 0 : index
    %c0_15 = arith.constant 0 : index
    %25 = vector.load %arg3[%c0_13, %c2, %c0_14, %c0_15] : memref<1x3x8x16xf32, #tpu.memory_space<vmem>>, vector<1x1x8x16xf32>
    %26 = vector.shape_cast %25 : vector<1x1x8x16xf32> to vector<8x16xf32>
    %27 = vector.shape_cast %1 : vector<8x16xf32> to vector<1x1x8x16xf32>
    tpu.vector_store %arg3[%c0_13, %c2, %c0_14, %c0_15], %27 {strides = array<i32>} : memref<1x3x8x16xf32, #tpu.memory_space<vmem>>, vector<1x1x8x16xf32>,
    return
  }
  func.func @transform_0(%arg0: i32, %arg1: i32) -> (i32, i32, i32, i32) {
    %c0_i32 = arith.constant 0 : i32
    %c0_i32_0 = arith.constant 0 : i32
    %c0_i32_1 = arith.constant 0 : i32
    return %arg0, %c0_i32, %arg1, %c0_i32_0 : i32, i32, i32, i32
  }
  func.func @transform_1(%arg0: i32, %arg1: i32) -> (i32, i32, i32, i32) {
    %c0_i32 = arith.constant 0 : i32
    %c0_i32_0 = arith.constant 0 : i32
    %c0_i32_1 = arith.constant 0 : i32
    return %arg0, %c0_i32, %arg1, %c0_i32_0 : i32, i32, i32, i32
  }
}

</mosaic_0001>

<bundles_post_ra>
// kernel: tpu_custom_call.1
= control target key start
LH: loop header
LB: loop body
LE: loop exit
PB: predicated region body
PF: predicated region fallthrough
CT: control target
= control target key end

     0   :  { %6 = vsyncpa [#allocation3], 0  ;;  %s722_s0 = inlined_call_operand.hbm [shape: f32[2,1,16,16], index: 0, kind: input, shape index: {}]   ;;  %s723_s1 = inlined_call_operand.hbm [shape: f32[2,3,16,16], index: 1, kind: output, shape index: {}]  }
   0x1   :  { %8 = vsyncpa [#allocation3 + $0x1], 0 }
   0x2   :  { %9 = vsyncpa [#allocation4], 0 }
   0x3   :  { %11 = vsyncpa [#allocation4 + $0x1], 0  ;;  %s521_s6 = smov 0   ;;  %s523_s7 = smov 0  }
   0x4   :  { %s525_s8 = smov 0   ;;  %s527_s9 = smov 0  }
   0x5   :  { %s529_s10 = smov 0   ;;  %s531_s11 = smov 0  }
   0x6   :  { %s533_s12 = smov 0   ;;  %s535_s13 = smov 0  }
   0x7 LB: > { %s276_s14 = sadd.s32 4294967295, %s504_s13   ;;  %s277_s15 = sadd.s32 4294967294, %s504_s13   ;;  %s504_s13 = sphi %s535_s13, %s17_s13   ;;  %s500_s12 = sphi %s533_s12, %s740_s12   ;;  %s496_s11 = sphi %s531_s11, %s739_s11   ;;  %s492_s10 = sphi %s529_s10, %s738_s10   ;;  %s488_s9 = sphi %s527_s9, %s737_s9   ;;  %s484_s8 = sphi %s525_s8, %s736_s8   ;;  %s480_s7 = sphi %s523_s7, %s735_s7   ;;  %s476_s6 = sphi %s521_s6, %s734_s6  }
   0x8   : > { %s26_s16 = sadd.s32 1, %s496_s11  ;;  %s29_s17 = sadd.s32 1, %s500_s12 }
   0x9   : > { %p27_p0 = scmp.ge.s32.totalorder %s26_s16, 2  ;;  %s38_s18 = sadd.s32 1, %s484_s8 }
   0xa   : > { %p45_p1 = scmp.ne.s32.totalorder %s484_s8, %s480_s7  ;;  %p46_p2 = scmp.eq.s32.totalorder %s504_s13, 0 }
   0xb   : > { %s742_s16 = smov (%p27_p0, %s26_s16), 0  ;;  %s744_s17 = smov (!%p27_p0, %s29_s17), %s500_s12 }
   0xc   : > { %s34_s19 = ssub.s32 %s496_s11, %s742_s16  ;;  %p574_p3 = por %p46_p2, %p45_p1 }
   0xd   : > { %p31_p4 = scmp.ge.s32.totalorder %s744_s17, 2  ;;  %p51_p5 = scmp.ne.s32.totalorder %s480_s7, %s476_s6 }
   0xe   : > { %p52_p6 = scmp.eq.s32.totalorder %s276_s14, 0  ;;  %p77_p7 = scmp.eq.s32.totalorder %s276_s14, 3 }
   0xf   : > { %s746_s17 = smov (%p31_p4, %s744_s17), 0  ;;  %p83_p10 = scmp.eq.s32.totalorder %s277_s15, 3 }
  0x10   : > { %p582_p8 = por %p52_p6, %p51_p5  ;;  %p586_p9 = por %p77_p7, %p45_p1 }
  0x11   : > { %s33_s23 = ssub.s32 %s500_s12, %s746_s17  ;;  %p592_p12 = por %p83_p10, %p51_p5 }
  0x12   : > { %s727_s22 = scalar_select %p586_p9, 1, 0 }
  0x13   : > { %s35_s24 = sor.u32 %s34_s19, %s33_s23  ;;  %p307_p13 = scmp.lt.s32.totalorder %s504_s13, 4 }
  0x14   : > { %p36_p11 = scmp.eq.s32.totalorder %s35_s24, 0  ;;  %s103_s26 = sand.u32 1, %s484_s8  }
  0x15   : > { %s728_s25 = scalar_select %p592_p12, 1, 0 }
  0x16   : > { %s599_s27 = scalar_select %p36_p11, %s484_s8, %s38_s18  }
  0x17   : > { %s280_s28 = sshll.u32 %s103_s26, 3  ;;  %s281_s29 = sshll.u32 %s500_s12, 1 }
  0x18   : > { %s112_s30 = sadd.s32 %s496_s11, %s281_s29  ;;  %s107_s2 = scalar_lea.vmem [#allocation2], %s280_s28 }
  0x19   : > { %s116_s3 = sshll.u32 %s107_s2, 4  ;;  %s282_s4 = sshll.u32 %s112_s30, 7  ;;  %s603_s3 = int_to_ptr.vmem [resolvable:$true] %s116_s3 }
  0x1a   : > { %s608_s15 = scalar_lea.hbm %s722_s0, %s282_s4  ;;  %p612_p0 = pnand %p307_p13, %p574_p3 }
  0x1b   : > { %s104_s19 = scalar_lea.sflag [#allocation3], %s103_s26  ;;  %s376_s23 = scalar_lea.hbm %s608_s15, 128 }
  0x1c   : > { %p377_p4 = scmp.ne.s32.totalorder %s608_s15, %s376_s23  ;;  %p378_p5 = pneg %p612_p0 }
  0x1d   : > { %s381_s28 = scalar_lea.hbm %s722_s0, 512  ;;  %p382_p3 = scmp.lt.u32.totalorder %s608_s15, %s722_s0 }
  0x1e   : > { %p379_p6 = pnand %p378_p5, %p377_p4  ;;  %p383_p10 = scmp.lt.u32.totalorder %s381_s28, %s376_s23 }
  0x1f   : > { %p385_p13 = scmp.lt.u32.totalorder %s376_s23, %s608_s15 }
  0x20   : > { %p380_p7 = pneg %p379_p6  ;;  %p384_p11 = por %p383_p10, %p382_p3 }
  0x22   : > { %p386_p1 = por %p385_p13, %p384_p11 }
  0x24   : > { %p387_p2 = pnand %p386_p1, %p380_p7 }
  0x26   : > { %390 = shalt.err (!%p387_p2)
}
  0x27   : > { %s391_s26 = scalar_lea.vmem %s603_s3, 128  ;;  %s506_s2 = smov [#allocation2]  }
  0x28   : > { %p392_p4 = scmp.ne.s32.totalorder %s603_s3, %s391_s26  ;;  %s396_s4 = sshll.u32 %s506_s2, 4  ;;  %s397_s4 = int_to_ptr.vmem [resolvable:$false] %s396_s4 }
  0x29   : > { %s398_s5 = scalar_lea.vmem %s397_s4, 256  ;;  %p399_p9 = scmp.lt.s32.totalorder %s603_s3, %s397_s4 }
  0x2a   : > { %p394_p6 = pnand %p392_p4, %p378_p5  ;;  %p400_p3 = scmp.lt.s32.totalorder %s398_s5, %s391_s26 }
  0x2c   : > { %p395_p12 = pneg %p394_p6  ;;  %p401_p10 = por %p400_p3, %p399_p9 }
  0x2e   : > { %p402_p11 = pnand %p401_p10, %p395_p12 }
  0x30   : > { %405 = shalt.err (!%p402_p11)
}
  0x31   : > { %302 = dma.hbm_to_vmem [thread:$0]  (!%p612_p0), %s608_s15, 128, %s603_s3, %s104_s19  }
  0x32   : > { %p730_p1 = scmp.lt.s32.totalorder %s504_s13, 5  ;;  %p731_p2 = scmp.ge.s32.totalorder %s504_s13, 1 }
  0x34   : > { %p122_p5 = pnand %p731_p2, %p730_p1 }
  0x35   : > { %s648_s14 = sand.u32 (!%p122_p5), 1, %s480_s7  }
  0x36   : > { %125 = sbr.rel (%p122_p5) target bundleno = 93 (0x5d), region = 24  ;;  %s284_s23 = sshll.u32 (!%p122_p5), %s648_s14, 3 }
  0x37   : > { %s128_s20 = scalar_lea.sflag (!%p122_p5), [#allocation3], %s648_s14  ;;  %s131_s24 = scalar_lea.vmem (!%p122_p5), [#allocation2], %s284_s23 }
  0x3d   : > { %467 = dma.done.wait (%p582_p8), %s128_s20, 128  }
  0x3e   : > { %469 = vsyncadd (%p582_p8), %s128_s20, 4294967168  ;;  %s293_s3 = smul.u32 24, %s648_s14  ;;  %v153_v0 = vlaneseq  ;;  %s285_s15 = sshll.u32 %s488_s9, 3  ;;  %vm166_vm0 = vcmask 130048   ;;  %v150_v8 = vld [vmem:[%s131_s24] sm:$0xff] }
  0x3f   : > { %s152_s18 = scvt.s32.f32 %s285_s15  ;;  %s294_s19 = smul.u32 6, %s492_s10 }
  0x40   : > { %v157_v1 = vand.u32 127, %v153_v0  ;;  %v154_v2 = vshrl.u32 %v153_v0, 7  ;;  %s149_s30 = scalar_lea.vmem [#allocation5], %s293_s3  ;;  %s174_s4 = scalar_lea.sflag [#allocation4], %s648_s14 }
  0x41   : > { %s287_s28 = sadd.f32 -120.25, %s152_s18  ;;  %s185_s29 = sadd.s32 %s488_s9, %s294_s19  ;;  %289 = vst.msk [vmem:[%s149_s30 + $0x10] sm:$0xff] %vm166_vm0, %v150_v8 }
  0x42   : > { %v158_v3 = vcvt.s32.f32 %v157_v1  ;;  %v155_v4 = vcvt.s32.f32 %v154_v2  ;;  %s188_s21 = sshll.u32 %s149_s30, 4  ;;  %s290_s26 = sshll.u32 %s185_s29, 7  ;;  %s660_s21 = int_to_ptr.vmem [resolvable:$true] %s188_s21 }
  0x43   : > { %v162_v5 = vstv %s287_s28  ;;  %s666_s2 = scalar_lea.hbm %s723_s1, %s290_s26  ;;  %s406_s5 = scalar_lea.vmem %s660_s21, 384 }
  0x44   : > { %v286_v6 = vadd.f32 -160.25, %v158_v3  ;;  %v163_v7 = vadd.f32 %v162_v5, %v155_v4  ;;  %p407_p8 = scmp.ne.s32.totalorder %s660_s21, %s406_s5  ;;  %p732_p9 = scmp.ne.s32.totalorder %s727_s22, 0 }
  0x45   : > { %s507_s23 = smov [#allocation5]  }
  0x46   : > { %v160_v9 = vmul.f32 0.0033934745, %v286_v6  ;;  %v164_v10 = vmul.f32 0.0033934745, %v163_v7  ;;  %p408_p12 = pnand %p407_p8, %p732_p9  ;;  %s410_s20 = sshll.u32 %s507_s23, 4  ;;  %s411_s20 = int_to_ptr.vmem [resolvable:$false] %s410_s20 }
  0x47   : > { %s412_s24 = scalar_lea.vmem %s411_s20, 768  ;;  %p413_p7 = scmp.lt.s32.totalorder %s660_s21, %s411_s20 }
  0x48   : > { %v165_v11 = vmul.f32 %v160_v9, %v150_v8  ;;  %v168_v12 = vmul.f32 %v164_v10, %v150_v8  ;;  %p409_p0 = pneg %p408_p12  ;;  %p414_p13 = scmp.lt.s32.totalorder %s412_s24, %s406_s5 }
  0x4a   : > { %167 = vst.msk [vmem:[%s149_s30] sm:$0xff] %vm166_vm0, %v165_v11  ;;  %288 = vst.msk [vmem:[%s149_s30 + $0x8] sm:$0xff] %vm166_vm0, %v168_v12  ;;  %p415_p4 = por %p414_p13, %p413_p7 }
  0x4c   : > { %p416_p6 = pnand %p415_p4, %p409_p0 }
  0x4e   : > { %419 = shalt.err (!%p416_p6)
}
  0x4f   : > { %s420_s3 = scalar_lea.hbm %s666_s2, 384  ;;  %s424_s19 = scalar_lea.hbm %s723_s1, 1536 }
  0x50   : > { %p421_p3 = scmp.ne.s32.totalorder %s666_s2, %s420_s3  ;;  %p425_p1 = scmp.lt.u32.totalorder %s666_s2, %s723_s1 }
  0x51   : > { %p426_p2 = scmp.lt.u32.totalorder %s424_s19, %s420_s3  ;;  %p428_p8 = scmp.lt.u32.totalorder %s420_s3, %s666_s2 }
  0x52   : > { %p422_p10 = pnand %p421_p3, %p732_p9 }
  0x53   : > { %p427_p5 = por %p426_p2, %p425_p1 }
  0x54   : > { %p423_p11 = pneg %p422_p10 }
  0x55   : > { %p429_p12 = por %p428_p8, %p427_p5 }
  0x57   : > { %p430_p0 = pnand %p429_p12, %p423_p11 }
  0x59   : > { %433 = shalt.err (!%p430_p0)
}
  0x5a   : > { %s508_s30 = smov 128   ;;  %s509_s26 = smov 256  }
  0x5b   : > { %s510_s9 = smov 8  }
  0x5c   : > { %297 = dma.vmem_to_hbm [thread:$0]  (%p732_p9), %s660_s21, 384, %s666_s2, %s174_s4, %s508_s30, %s509_s26, %s510_s9  }
  0x5d PF: > { %p308_p7 = scmp.ge.s32.totalorder %s504_s13, 2  ;;  %s203_s10 = sand.u32 1, %s476_s6  }
  0x5e   : > { %p733_p13 = scmp.ne.s32.totalorder %s728_s25, 0  ;;  %s204_s5 = scalar_lea.sflag [#allocation4], %s203_s10 }
  0x60   : > { %p304_p4 = pnand %p308_p7, %p733_p13 }
  0x62   : > { %471 = dma.done.wait (!%p304_p4), %s204_s5, 384  }
  0x63   : > { %473 = vsyncadd (!%p304_p4), %s204_s5, 4294966912  ;;  %s17_s13 = sadd.s32 1, %s504_s13   ;;  %s734_s6 = smov %s480_s7 }
  0x64   : > { %p14_p6 = scmp.ge.s32.totalorder %s17_s13, 6   ;;  %s735_s7 = smov %s484_s8 }
  0x65   : > { %s736_s8 = smov %s599_s27  ;;  %s737_s9 = smov %s496_s11 }
  0x66   : > { %s738_s10 = smov %s500_s12  ;;  %s739_s11 = smov %s742_s16 }
  0x67   : > { %s740_s12 = smov %s746_s17  ;;  %16 = sbr.rel (!%p14_p6) target bundleno = 7 (0x7), region = 71 }
  0x6e   :  { %209 = vsyncpa [#allocation3], 1 }
  0x6f   :  { %211 = vsyncpa [#allocation3 + $0x1], 1 }
  0x70   :  { %212 = vsyncpa [#allocation4], 1 }
  0x71   :  { %214 = vsyncpa [#allocation4 + $0x1], 1 }

</bundles_post_ra>
